<compile_context>
chip_gen: v6e
topology: v6e:2x2x1
jax: 0.10.0
libtpu: 0.0.40
codegen_flags: <defaults>
</compile_context>

<pallas_src>
import jax
import jax.numpy as jnp
from jax.experimental import pallas as pl
from jax.experimental.pallas import tpu as pltpu


def _round_up(x, m):
    return (x + m - 1) // m * m


def _pick_divisor_tile(n, cap, align):
    """Largest d <= cap with d % align == 0 and n % d == 0 (n multiple of align)."""
    best = align
    d = align
    limit = min(cap, n)
    while d <= limit:
        if n % d == 0:
            best = d
        d += align
    return min(best, n)


def _batch_tiling(batch):
    """Return (b_pad, tm). Pad B only to a multiple of 8 (never to a tile size)
    and pick tm as a divisor of b_pad. For B >= 64 prefer >= 2 batch tiles so
    both v7x TensorCores get work via the 'parallel' grid axis."""
    if batch <= 64:
        return batch, batch  # single block; block dim == full dim is always legal
    b_pad = _round_up(batch, 8)
    cap = max(8, min(512, b_pad // 2))
    tm = _pick_divisor_tile(b_pad, cap, 8)
    return b_pad, tm


# ---------------------------------------------------------------------------
# Kernels
# ---------------------------------------------------------------------------

def _concat_linear_resident_kernel(t_ref, x_ref, w_ref, wt_ref, b_ref, o_ref):
    # Single K block (whole Din), whole W resident in VMEM, no accumulator.
    # t_ref: (TM, 1) f32, x_ref: (TM, Din), w_ref: (Din, Dout),
    # wt_ref/b_ref: (1, Dout) f32, o_ref: (TM, Dout).
    acc = jnp.dot(x_ref[...], w_ref[...], preferred_element_type=jnp.float32)
    acc = acc + t_ref[...] * wt_ref[...] + b_ref[...]   # rank-1 time term + bias (VPU)
    o_ref[...] = acc.astype(o_ref.dtype)


def _concat_linear_tiled_kernel(t_ref, x_ref, w_ref, wt_ref, b_ref, o_ref, acc_ref):
    # Fallback for layers whose W does not fit in VMEM. Grid = (j, i, k) with
    # Dout outermost and K innermost; f32 accumulator resident across K.
    k = pl.program_id(2)

    @pl.when(k == 0)
    def _():
        acc_ref[...] = jnp.zeros_like(acc_ref)

    acc_ref[...] += jnp.dot(x_ref[...], w_ref[...],
                            preferred_element_type=jnp.float32)

    @pl.when(k == pl.num_programs(2) - 1)
    def _():
        out = acc_ref[...] + t_ref[...] * wt_ref[...] + b_ref[...]
        o_ref[...] = out.astype(o_ref.dtype)


# ---------------------------------------------------------------------------
# One-time parameter prep + per-call apply
# ---------------------------------------------------------------------------

def make_concat_linear(weight, bias, *, compute_dtype=None,
                       w_resident_bytes=4 * 1024 * 1024,
                       vmem_limit_bytes=32 * 1024 * 1024):
    """One-time prep for ConcatLinear. Returns apply(t, x).

    weight: (dim_out, dim_in + 1), bias: (dim_out,)  -- nn.Linear params.
    compute_dtype: optionally jnp.bfloat16 to halve x/W HBM traffic and use the
      bf16-native MXU (f32 accumulation + f32 bias/time epilogue are kept).
    """
    weight = jnp.asarray(weight)
    bias = jnp.asarray(bias)
    dout, din_p1 = weight.shape
    din = din_p1 - 1
    assert din >= 1 and bias.shape == (dout,)

    wdt = compute_dtype if compute_dtype is not None else weight.dtype
    itemsize = jnp.dtype(wdt).itemsize
    resident = din * dout * itemsize <= w_resident_bytes

    if resident:
        # No feature-dim padding at all: block shapes will equal the full dims.
        w_x = jnp.asarray(weight[:, 1:].T, dtype=wdt)            # (Din, Dout)
        w_t = jnp.asarray(weight[:, :1].T, dtype=jnp.float32)    # (1, Dout)
        b2 = jnp.asarray(bias.reshape(1, dout), dtype=jnp.float32)

        def apply(t, x):
            batch = x.shape[0]
            assert x.shape[1] == din
            out_dtype = x.dtype
            cdt = compute_dtype if compute_dtype is not None else x.dtype

            b_pad, tm = _batch_tiling(batch)
            t2 = jnp.broadcast_to(
                jnp.asarray(t, dtype=jnp.float32).reshape(-1, 1), (batch, 1))
            xk = x.astype(cdt)
            if b_pad != batch:  # only pad B, and only when actually needed
                xk = jnp.pad(xk, ((0, b_pad - batch), (0, 0)))
                t2 = jnp.pad(t2, ((0, b_pad - batch), (0, 0)))

            grid = (b_pad // tm,)
            out = pl.pallas_call(
                _concat_linear_resident_kernel,
                out_shape=jax.ShapeDtypeStruct((b_pad, dout), out_dtype),
                grid_spec=pltpu.PrefetchScalarGridSpec(
                    num_scalar_prefetch=0,
                    grid=grid,
                    in_specs=[
                        pl.BlockSpec((tm, 1), lambda i: (i, 0)),       # t
                        pl.BlockSpec((tm, din), lambda i: (i, 0)),     # x stream
                        pl.BlockSpec((din, dout), lambda i: (0, 0)),   # W resident
                        pl.BlockSpec((1, dout), lambda i: (0, 0)),     # w_t
                        pl.BlockSpec((1, dout), lambda i: (0, 0)),     # bias
                    ],
                    out_specs=pl.BlockSpec((tm, dout), lambda i: (i, 0)),
                ),
                compiler_params=pltpu.CompilerParams(
                    dimension_semantics=("parallel",),
                    vmem_limit_bytes=vmem_limit_bytes,
                ),
            )(t2, xk, w_x, w_t, b2)
            return out if b_pad == batch else out[:batch]

        return apply

    # ---- Tiled fallback: W too large to keep resident in VMEM ----
    din_pad = _round_up(din, 128)
    dout_pad = _round_up(dout, 128)
    w_x = jnp.pad(weight[:, 1:].T,
                  ((0, din_pad - din), (0, dout_pad - dout))).astype(wdt)
    w_t = jnp.pad(weight[:, :1].T,
                  ((0, 0), (0, dout_pad - dout))).astype(jnp.float32)
    b2 = jnp.pad(bias.reshape(1, dout),
                 ((0, 0), (0, dout_pad - dout))).astype(jnp.float32)

    tn = _pick_divisor_tile(dout_pad, 256, 128)          # keep N tiles MXU-wide
    tk = din_pad if din_pad <= 1024 else _pick_divisor_tile(din_pad, 512, 128)

    def apply(t, x):
        batch = x.shape[0]
        assert x.shape[1] == din
        out_dtype = x.dtype
        cdt = compute_dtype if compute_dtype is not None else x.dtype

        b_pad, tm = _batch_tiling(batch)
        t2 = jnp.broadcast_to(
            jnp.asarray(t, dtype=jnp.float32).reshape(-1, 1), (batch, 1))
        xk = x.astype(cdt)
        pad_rows = b_pad - batch
        pad_cols = din_pad - din
        if pad_rows or pad_cols:
            xk = jnp.pad(xk, ((0, pad_rows), (0, pad_cols)))
        if pad_rows:
            t2 = jnp.pad(t2, ((0, pad_rows), (0, 0)))

        grid = (dout_pad // tn, b_pad // tm, din_pad // tk)
        out = pl.pallas_call(
            _concat_linear_tiled_kernel,
            out_shape=jax.ShapeDtypeStruct((b_pad, dout_pad), out_dtype),
            grid_spec=pltpu.PrefetchScalarGridSpec(
                num_scalar_prefetch=0,
                grid=grid,
                in_specs=[
                    pl.BlockSpec((tm, 1), lambda j, i, k: (i, 0)),   # t
                    pl.BlockSpec((tm, tk), lambda j, i, k: (i, k)),  # x
                    pl.BlockSpec((tk, tn), lambda j, i, k: (k, j)),  # W
                    pl.BlockSpec((1, tn), lambda j, i, k: (0, j)),   # w_t
                    pl.BlockSpec((1, tn), lambda j, i, k: (0, j)),   # bias
                ],
                out_specs=pl.BlockSpec((tm, tn), lambda j, i, k: (i, j)),
                scratch_shapes=[pltpu.VMEM((tm, tn), jnp.float32)],
            ),
            compiler_params=pltpu.CompilerParams(
                dimension_semantics=("parallel", "parallel", "arbitrary"),
                vmem_limit_bytes=vmem_limit_bytes,
            ),
        )(t2, xk, w_x, w_t, b2)

        if pad_rows:
            out = out[:batch]
        if dout_pad != dout:
            out = out[:, :dout]
        return out

    return apply


def concat_linear(t, x, weight, bias, **kwargs):
    """Convenience one-shot wrapper. For repeated calls (ODE loops), call
    make_concat_linear(weight, bias) once and reuse the returned apply."""
    return make_concat_linear(weight, bias, **kwargs)(t, x)


# ---------------------------------------------------------------------------
# Self-test
# ---------------------------------------------------------------------------

def _ref_concat_linear(t, x, weight, bias):
    tt = jnp.ones_like(x[:, :1]) * t[:, None]
    ttx = jnp.concatenate([tt, x], axis=1)
    return jnp.dot(ttx, weight.T, precision=jax.lax.Precision.HIGHEST) + bias


if __name__ == "__main__":
    key = jax.random.PRNGKey(0)

    def make_linear_params(k, din, dout):
        k_w, k_b = jax.random.split(k)
        fan_in = din + 1
        bound = 1.0 / (fan_in ** 0.5)
        weight = jax.random.uniform(k_w, (dout, din + 1), minval=-bound,
                                    maxval=bound, dtype=jnp.float32)
        bias = jax.random.uniform(k_b, (dout,), minval=-bound,
                                  maxval=bound, dtype=jnp.float32)
        return weight, bias

    # (B, dim_in, dim_out, w_resident_bytes). The last case forces the tiled
    # fallback path (multi-K accumulation, Dout padding, multi batch tiles).
    cases = [
        (8, 32, 32, 4 * 1024 * 1024),     # tiny: resident W, single batch tile
        (300, 37, 45, 4 * 1024 * 1024),   # unaligned dims: resident W, 2 batch tiles
        (72, 1100, 200, 0),               # forced tiled path: k > 1, padded Dout/Din
    ]

    for idx, (B, din, dout, wbytes) in enumerate(cases):
        key, k_t, k_x, k_p = jax.random.split(key, 4)
        t = jax.random.normal(k_t, (B,), dtype=jnp.float32)
        x = jax.random.normal(k_x, (B, din), dtype=jnp.float32)
        weight, bias = make_linear_params(k_p, din, dout)

        apply_fn = make_concat_linear(weight, bias, w_resident_bytes=wbytes)
        out = jax.block_until_ready(apply_fn(t, x))

        ref = _ref_concat_linear(t, x, weight, bias)
        assert out.shape == (B, dout), f"case {idx}: wrong shape {out.shape}"
        assert jnp.allclose(out, ref, atol=1e-3, rtol=1e-3), \
            f"case {idx}: mismatch vs reference"

    # TODO(synk): self.bn (BatchNorm1d) is created in __init__ but never used in
    # forward, so it is intentionally not implemented here.
    print("KERNEL_OK")
</pallas_src>

<mosaic_0001>
module attributes {stable_mosaic.version = 11 : i64} {
  func.func @_concat_linear_resident_kernel(%arg0: i32, %arg1: memref<8x1xf32, #tpu.memory_space<vmem>>, %arg2: memref<8x32xf32, #tpu.memory_space<vmem>>, %arg3: memref<32x32xf32, #tpu.memory_space<vmem>>, %arg4: memref<1x32xf32, #tpu.memory_space<vmem>>, %arg5: memref<1x32xf32, #tpu.memory_space<vmem>>, %arg6: memref<8x32xf32, #tpu.memory_space<vmem>>) attributes {dimension_semantics = [#tpu.dimension_semantics<parallel>], iteration_bounds = array<i64: 1>, scalar_prefetch = 0 : i64, scratch_operands = 0 : i64, tpu.core_type = #tpu.core_type<tc>, window_params = [{transform_indices = @transform_0, window_bounds = array<i64: 8, 1>}, {transform_indices = @transform_1, window_bounds = array<i64: 8, 32>}, {pipeline_mode = #tpu.pipeline_mode<synchronous>, transform_indices = @transform_2, window_bounds = array<i64: 32, 32>}, {pipeline_mode = #tpu.pipeline_mode<synchronous>, transform_indices = @transform_3, window_bounds = array<i64: 1, 32>}, {pipeline_mode = #tpu.pipeline_mode<synchronous>, transform_indices = @transform_4, window_bounds = array<i64: 1, 32>}, {transform_indices = @transform_5, window_bounds = array<i64: 8, 32>}]} {
    %c0 = arith.constant 0 : index
    %c0_0 = arith.constant 0 : index
    %0 = vector.load %arg2[%c0, %c0_0] : memref<8x32xf32, #tpu.memory_space<vmem>>, vector<8x32xf32>
    %c0_1 = arith.constant 0 : index
    %c0_2 = arith.constant 0 : index
    %1 = vector.load %arg3[%c0_1, %c0_2] : memref<32x32xf32, #tpu.memory_space<vmem>>, vector<32x32xf32>
    %cst = arith.constant dense<0.000000e+00> : vector<8x32xf32>
    %2 = tpu.matmul %0, %1, %cst {dimension_numbers = #tpu.dot_dimension_numbers<[1], [0], [0], [1], [0, 0, 1, 1], [], []>} : vector<8x32xf32>, vector<32x32xf32>, vector<8x32xf32> -> vector<8x32xf32>
    %c0_3 = arith.constant 0 : index
    %c0_4 = arith.constant 0 : index
    %3 = vector.load %arg1[%c0_3, %c0_4] : memref<8x1xf32, #tpu.memory_space<vmem>>, vector<8x1xf32>
    %c0_5 = arith.constant 0 : index
    %c0_6 = arith.constant 0 : index
    %4 = vector.load %arg4[%c0_5, %c0_6] : memref<1x32xf32, #tpu.memory_space<vmem>>, vector<1x32xf32>
    %5 = vector.broadcast %3 : vector<8x1xf32> to vector<8x32xf32>
    %6 = vector.broadcast %4 : vector<1x32xf32> to vector<8x32xf32>
    %7 = arith.mulf %5, %6 : vector<8x32xf32>
    %8 = arith.addf %2, %7 : vector<8x32xf32>
    %c0_7 = arith.constant 0 : index
    %c0_8 = arith.constant 0 : index
    %9 = vector.load %arg5[%c0_7, %c0_8] : memref<1x32xf32, #tpu.memory_space<vmem>>, vector<1x32xf32>
    %10 = vector.broadcast %9 : vector<1x32xf32> to vector<8x32xf32>
    %11 = arith.addf %8, %10 : vector<8x32xf32>
    %c0_9 = arith.constant 0 : index
    %c0_10 = arith.constant 0 : index
    %12 = vector.load %arg6[%c0_9, %c0_10] : memref<8x32xf32, #tpu.memory_space<vmem>>, vector<8x32xf32>
    tpu.vector_store %arg6[%c0_9, %c0_10], %11 {strides = array<i32>} : memref<8x32xf32, #tpu.memory_space<vmem>>, vector<8x32xf32>,
    return
  }
  func.func @transform_0(%arg0: i32) -> (i32, i32) {
    %c0_i32 = arith.constant 0 : i32
    %c0_i32_0 = arith.constant 0 : i32
    return %arg0, %c0_i32 : i32, i32
  }
  func.func @transform_1(%arg0: i32) -> (i32, i32) {
    %c0_i32 = arith.constant 0 : i32
    %c0_i32_0 = arith.constant 0 : i32
    return %arg0, %c0_i32 : i32, i32
  }
  func.func @transform_2(%arg0: i32) -> (i32, i32) {
    %c0_i32 = arith.constant 0 : i32
    %c0_i32_0 = arith.constant 0 : i32
    %c0_i32_1 = arith.constant 0 : i32
    return %c0_i32, %c0_i32_0 : i32, i32
  }
  func.func @transform_3(%arg0: i32) -> (i32, i32) {
    %c0_i32 = arith.constant 0 : i32
    %c0_i32_0 = arith.constant 0 : i32
    %c0_i32_1 = arith.constant 0 : i32
    return %c0_i32, %c0_i32_0 : i32, i32
  }
  func.func @transform_4(%arg0: i32) -> (i32, i32) {
    %c0_i32 = arith.constant 0 : i32
    %c0_i32_0 = arith.constant 0 : i32
    %c0_i32_1 = arith.constant 0 : i32
    return %c0_i32, %c0_i32_0 : i32, i32
  }
  func.func @transform_5(%arg0: i32) -> (i32, i32) {
    %c0_i32 = arith.constant 0 : i32
    %c0_i32_0 = arith.constant 0 : i32
    return %arg0, %c0_i32 : i32, i32
  }
}

</mosaic_0001>

<bundles_post_ra>
// kernel: tpu_custom_call.1
= control target key start
LH: loop header
LB: loop body
LE: loop exit
PB: predicated region body
PF: predicated region fallthrough
CT: control target
= control target key end

     0   :  { %10 = vsyncpa [#allocation3], 0  ;;  %s278_s0 = inlined_call_operand.vmem [shape: f32[8,1], index: 0, kind: input, shape index: {}]   ;;  %s279_s1 = inlined_call_operand.vmem [shape: f32[8,32], index: 1, kind: input, shape index: {}]   ;;  %s280_s2 = inlined_call_operand.hbm [shape: f32[32,32], index: 2, kind: input, shape index: {}]   ;;  %s281_s3 = inlined_call_operand.vmem [shape: f32[1,32], index: 3, kind: input, shape index: {}]   ;;  %s282_s4 = inlined_call_operand.vmem [shape: f32[1,32], index: 4, kind: input, shape index: {}]   ;;  %s283_s5 = inlined_call_operand.hbm [shape: f32[8,32], index: 5, kind: output, shape index: {}]  }
   0x1   :  { %11 = vsyncpa [#allocation4], 0  ;;  %s223_s18 = smov [#allocation2]  }
   0x2   :  { %s21_s19 = sshll.u32 %s223_s18, 4  ;;  %s22_s19 = int_to_ptr.vmem [resolvable:$true] %s21_s19 }
   0x3   :  { %s187_s20 = scalar_lea.vmem %s22_s19, 512  ;;  %p192_p1 = scmp.lt.s32.totalorder %s22_s19, %s22_s19 }
   0x4   :  { %p188_p0 = scmp.ne.s32.totalorder %s22_s19, %s187_s20  ;;  %p193_p2 = scmp.lt.s32.totalorder %s187_s20, %s187_s20 }
   0x6   :  { %p194_p3 = por %p193_p2, %p192_p1 }
   0x8   :  { %p195_p4 = pnand %p194_p3, %p188_p0 }
   0xa   :  { %198 = shalt.err (!%p195_p4)
}
   0xb   :  { %s224_s21 = smov 128   ;;  %s225_s22 = smov 8  }
   0xc   :  { %27 = dma.hbm_to_vmem [thread:$0]  %s280_s2, 512, %s22_s19, [#allocation3], %s224_s21, %s224_s21, %s225_s22  }
   0xd   :  { %219 = dma.done.wait [#allocation3], 512  }
   0xe   :  { %220 = vsyncadd [#allocation3], 4294966784  ;;  %v226_v0 = vmov 0.0   ;;  %vm227_vm0 = vmmov 0   ;;  %v228_v1 = vmov 0   ;;  %v39_v2 = vld [vmem:[#allocation2 + $0x18] sm:$0xff] }
   0xf   :  { %160 = vmatprep.subr.mxu0 %v226_v0  ;;  %168 = vmatprep.mubr.msk.f32.mxu0 %vm227_vm0, %v226_v0  ;;  %v38_v3 = vld [vmem:[#allocation2 + $0x10] sm:$0xff]  ;;  %v40_v4 = vld [vmem:[%s278_s0] sm:$0xff]  ;;  %v37_v5 = vld [vmem:[#allocation2 + $0x8] sm:$0xff]  ;;  %vm54_vm1 = vcmask 261120   ;;  %s229_s6 = smov [#allocation5]  }
  0x10   :  { %178 = vset.pattern.permute.xlu0 %v228_v1  ;;  %161 = vmatpush3.msra.mxu0 %v39_v2  ;;  %v36_v6 = vld [vmem:[#allocation2] sm:$0xff]  ;;  %s143_s7 = sshll.u32 %s229_s6, 4  ;;  %s144_s7 = int_to_ptr.vmem [resolvable:$true] %s143_s7 }
  0x11   :  { %162 = vmatprep.subr.mxu0 %v226_v0  ;;  %44 = vperm.xlu0 %178, %v40_v4   ;;  %v35_v7 = vld [vmem:[%s279_s1] sm:$0xff]  ;;  %s199_s1 = scalar_lea.vmem %s144_s7, 128  ;;  %p204_p6 = scmp.lt.s32.totalorder %s144_s7, %s144_s7 }
  0x12   :  { %163 = vmatpush3.msra.mxu0 %v38_v3  ;;  %v152_v8 = vld [vmem:[%s281_s3] ss:$0 sm:$0xff]  ;;  %p200_p5 = scmp.ne.s32.totalorder %s144_s7, %s199_s1  ;;  %p205_p7 = scmp.lt.s32.totalorder %s199_s1, %s199_s1 }
  0x13   :  { %164 = vmatprep.subr.mxu0 %v226_v0  ;;  %v154_v12 = vld [vmem:[%s282_s4] ss:$0 sm:$0xff] }
  0x14   :  { %165 = vmatpush3.msra.mxu0 %v37_v5  ;;  %p206_p8 = por %p205_p7, %p204_p6 }
  0x15   :  { %166 = vmatprep.subr.mxu0 %v226_v0 }
  0x16   :  { %167 = vmatpush3.msra.mxu0 %v36_v6  ;;  %p207_p9 = pnand %p206_p8, %p200_p5 }
  0x17   :  { %169 = vmatmul.mubr.msk.f32.vlgmr.msra.gmra.mxu0 %vm54_vm1, %v35_v7 }
  0x8c   :  { %v45_v9 = vpop.permute.xlu0 %44 }
  0x8d   :  { %v53_v10 = vmul.f32 %v152_v8, %v45_v9 }
  0xd7   :  { %v124_v11 = vpop.f32.mrf.mxu0 }
  0xd8   :  { %v125_v13 = vadd.f32 %v124_v11, %v53_v10 }
  0xd9   :  { %v170_v14 = vpop.f32.mrf.mxu0 }
  0xda   :  { %v135_v15 = vadd.f32 %v154_v12, %v125_v13 }
  0xdc   :  { %136 = vst.msk [vmem:[#allocation5] sm:$0xff] %vm54_vm1, %v135_v15 }
  0xdd   :  { %210 = shalt.err (!%p207_p9)
}
  0xde   :  { %146 = dma.vmem_to_hbm [thread:$0]  %s144_s7, 128, %s283_s5, [#allocation4]  }
  0xdf   :  { %221 = dma.done.wait [#allocation4], 128  }
  0xe0   :  { %222 = vsyncadd [#allocation4], 4294967168 }
  0xe1   :  { %150 = vsyncpa [#allocation3], 1 }
  0xe2   :  { %151 = vsyncpa [#allocation4], 1 }

</bundles_post_ra>
